<compile_context>
chip_gen: v7x
topology: tpu7x:2x2x1
jax: 0.10.0
libtpu: 0.0.40
codegen_flags: <defaults>
</compile_context>

<pallas_src>
import jax
import jax.numpy as jnp
from jax.experimental import pallas as pl
from jax.experimental.pallas import tpu as pltpu

IN_DIM, H1_DIM, H2_DIM = 784, 64, 32


def _mlp_kernel(x_ref, w1_ref, b1_ref, w2_ref, b2_ref, o_ref):
    # Cast x to bf16 in-kernel so the wrapper never materializes a second copy
    # of x in HBM (the cast is fully hidden under the x DMA).
    x = x_ref[...].astype(jnp.bfloat16)

    # hidden_1: Linear(784, 64) + ReLU. bf16 operands -> native MXU path, f32 accumulate.
    h1 = jnp.dot(x, w1_ref[...], preferred_element_type=jnp.float32)
    h1 = jnp.maximum(h1 + b1_ref[...], 0.0)

    # hidden_2: Linear(64, 32) + ReLU.
    h2 = jnp.dot(h1.astype(jnp.bfloat16), w2_ref[...],
                 preferred_element_type=jnp.float32)
    h2 = jnp.maximum(h2 + b2_ref[...], 0.0)

    # softmax over the class dim (matches F.softmax dim=1 for 2D input).
    # Exact f32 division: rows sum to 1 to f32 precision (the approx EUP
    # reciprocal previously broke the row-sum check; exact path is ~free here).
    m = jnp.max(h2, axis=-1, keepdims=True)
    e = jnp.exp(h2 - m)
    denom = jnp.sum(e, axis=-1, keepdims=True)
    o_ref[...] = (e / denom).astype(o_ref.dtype)


def _round_up(n, m):
    return ((n + m - 1) // m) * m


def nnet_forward(x, w1, b1, w2, b2, *, block_rows=2048):
    """x: [B, 784]; w1: [784, 64]; b1: [64] or [1, 64]; w2: [64, 32]; b2: [32] or [1, 32]."""
    B = x.shape[0]

    # Batch tiling: tiles are multiples of 8 rows (f32 sublane).  No wrapper-side
    # pad or dtype cast of x (either would duplicate the dominant HBM traffic).
    # The last grid block may overrun B; rows are independent and out-of-bounds
    # output rows are dropped by the masked writeback.
    b8 = _round_up(B, 8)
    n_tiles = max(pl.cdiv(b8, block_rows), 2 if b8 >= 16 else 1)  # >=2 tiles feeds both v7x TCs
    tm = _round_up(pl.cdiv(b8, n_tiles), 8)
    grid = pl.cdiv(B, tm)

    # Weights are tiny (~52K params): cast once to bf16 for the MXU.
    w1_bf16 = w1.astype(jnp.bfloat16)
    w2_bf16 = w2.astype(jnp.bfloat16)
    b1_f32 = b1.astype(jnp.float32).reshape(1, H1_DIM)
    b2_f32 = b2.astype(jnp.float32).reshape(1, H2_DIM)

    cost = pl.CostEstimate(
        flops=2 * B * (IN_DIM * H1_DIM + H1_DIM * H2_DIM),
        transcendentals=B * H2_DIM,
        bytes_accessed=(B * IN_DIM * x.dtype.itemsize   # x streamed as-is
                        + IN_DIM * H1_DIM * 2           # w1 (bf16)
                        + H1_DIM * H2_DIM * 2           # w2 (bf16)
                        + (H1_DIM + H2_DIM) * 4         # biases (f32)
                        + B * H2_DIM * 4),              # output (f32)
    )

    # TODO(synk): optional further HBM savings (bf16/fp8/int8 x, bf16 output)
    # left out pending accuracy requirements of the consumer.
    out = pl.pallas_call(
        _mlp_kernel,
        out_shape=jax.ShapeDtypeStruct((B, H2_DIM), jnp.float32),
        grid=(grid,),
        in_specs=[
            pl.BlockSpec((tm, IN_DIM), lambda i: (i, 0)),       # x: tiled over batch
            pl.BlockSpec((IN_DIM, H1_DIM), lambda i: (0, 0)),   # w1: VMEM-resident
            pl.BlockSpec((1, H1_DIM), lambda i: (0, 0)),        # b1: resident
            pl.BlockSpec((H1_DIM, H2_DIM), lambda i: (0, 0)),   # w2: resident
            pl.BlockSpec((1, H2_DIM), lambda i: (0, 0)),        # b2: resident
        ],
        out_specs=pl.BlockSpec((tm, H2_DIM), lambda i: (i, 0)),
        compiler_params=pltpu.CompilerParams(
            dimension_semantics=("parallel",),
            vmem_limit_bytes=48 * 1024 * 1024,
        ),
        cost_estimate=cost,
    )(x, w1_bf16, b1_f32, w2_bf16, b2_f32)
    return out


def _reference(x, w1, b1, w2, b2):
    # Mirrors the kernel's bf16-operand / f32-accumulate matmuls for a tight tolerance.
    h1 = jnp.dot(x.astype(jnp.bfloat16), w1.astype(jnp.bfloat16),
                 preferred_element_type=jnp.float32) + b1.reshape(1, -1)
    h1 = jnp.maximum(h1, 0.0)
    h2 = jnp.dot(h1.astype(jnp.bfloat16), w2.astype(jnp.bfloat16),
                 preferred_element_type=jnp.float32) + b2.reshape(1, -1)
    h2 = jnp.maximum(h2, 0.0)
    return jax.nn.softmax(h2, axis=-1)


if __name__ == "__main__":
    key = jax.random.PRNGKey(0)
    k_x, k_w1, k_b1, k_w2, k_b2 = jax.random.split(key, 5)

    B = 8

    x = jax.random.normal(k_x, (B, IN_DIM), dtype=jnp.float32)

    # Deterministic init mimicking nn.Linear's uniform(-1/sqrt(fan_in), 1/sqrt(fan_in)).
    lim1 = 1.0 / jnp.sqrt(jnp.float32(IN_DIM))
    lim2 = 1.0 / jnp.sqrt(jnp.float32(H1_DIM))
    w1 = jax.random.uniform(k_w1, (IN_DIM, H1_DIM), jnp.float32, -lim1, lim1)  # transposed vs torch
    b1 = jax.random.uniform(k_b1, (H1_DIM,), jnp.float32, -lim1, lim1)
    w2 = jax.random.uniform(k_w2, (H1_DIM, H2_DIM), jnp.float32, -lim2, lim2)  # transposed vs torch
    b2 = jax.random.uniform(k_b2, (H2_DIM,), jnp.float32, -lim2, lim2)

    out = nnet_forward(x, w1, b1, w2, b2)
    out = jax.block_until_ready(out)

    ref = _reference(x, w1, b1, w2, b2)
    assert out.shape == (B, H2_DIM)
    # bf16 matmul inputs -> loosened (but still tight) tolerance vs the bf16 reference.
    assert jnp.allclose(out, ref, atol=5e-3, rtol=5e-3), "mismatch vs reference"
    # Exact f32 softmax normalization in the kernel: rows sum to 1 to f32 precision.
    assert jnp.allclose(jnp.sum(out, axis=-1), 1.0, atol=1e-3), "softmax rows must sum to ~1"

    print("KERNEL_OK")
</pallas_src>

<mosaic_0001>
module attributes {stable_mosaic.version = 11 : i64} {
  func.func @_mlp_kernel(%arg0: i32, %arg1: memref<8x784xf32, #tpu.memory_space<vmem>>, %arg2: memref<784x64xbf16, #tpu.memory_space<vmem>>, %arg3: memref<1x64xf32, #tpu.memory_space<vmem>>, %arg4: memref<64x32xbf16, #tpu.memory_space<vmem>>, %arg5: memref<1x32xf32, #tpu.memory_space<vmem>>, %arg6: memref<8x32xf32, #tpu.memory_space<vmem>>) attributes {dimension_semantics = [#tpu.dimension_semantics<parallel>], iteration_bounds = array<i64: 1>, scalar_prefetch = 0 : i64, scratch_operands = 0 : i64, tpu.core_type = #tpu.core_type<tc>, window_params = [{transform_indices = @transform_0, window_bounds = array<i64: 8, 784>}, {pipeline_mode = #tpu.pipeline_mode<synchronous>, transform_indices = @transform_1, window_bounds = array<i64: 784, 64>}, {pipeline_mode = #tpu.pipeline_mode<synchronous>, transform_indices = @transform_2, window_bounds = array<i64: 1, 64>}, {pipeline_mode = #tpu.pipeline_mode<synchronous>, transform_indices = @transform_3, window_bounds = array<i64: 64, 32>}, {pipeline_mode = #tpu.pipeline_mode<synchronous>, transform_indices = @transform_4, window_bounds = array<i64: 1, 32>}, {transform_indices = @transform_5, window_bounds = array<i64: 8, 32>}]} {
    %c0 = arith.constant 0 : index
    %c0_0 = arith.constant 0 : index
    %0 = vector.load %arg1[%c0, %c0_0] : memref<8x784xf32, #tpu.memory_space<vmem>>, vector<8x784xf32>
    %1 = arith.truncf %0 : vector<8x784xf32> to vector<8x784xbf16>
    %c0_1 = arith.constant 0 : index
    %c0_2 = arith.constant 0 : index
    %2 = vector.load %arg2[%c0_1, %c0_2] : memref<784x64xbf16, #tpu.memory_space<vmem>>, vector<784x64xbf16>
    %cst = arith.constant dense<0.000000e+00> : vector<8x64xf32>
    %3 = tpu.matmul %1, %2, %cst {dimension_numbers = #tpu.dot_dimension_numbers<[1], [0], [0], [1], [0, 0, 1, 1], [], []>} : vector<8x784xbf16>, vector<784x64xbf16>, vector<8x64xf32> -> vector<8x64xf32>
    %c0_3 = arith.constant 0 : index
    %c0_4 = arith.constant 0 : index
    %4 = vector.load %arg3[%c0_3, %c0_4] : memref<1x64xf32, #tpu.memory_space<vmem>>, vector<1x64xf32>
    %5 = vector.broadcast %4 : vector<1x64xf32> to vector<8x64xf32>
    %6 = arith.addf %3, %5 : vector<8x64xf32>
    %cst_5 = arith.constant 0.000000e+00 : f32
    %7 = vector.broadcast %cst_5 : f32 to vector<8x64xf32>
    %8 = arith.maximumf %6, %7 : vector<8x64xf32>
    %9 = arith.truncf %8 : vector<8x64xf32> to vector<8x64xbf16>
    %c0_6 = arith.constant 0 : index
    %c0_7 = arith.constant 0 : index
    %10 = vector.load %arg4[%c0_6, %c0_7] : memref<64x32xbf16, #tpu.memory_space<vmem>>, vector<64x32xbf16>
    %cst_8 = arith.constant dense<0.000000e+00> : vector<8x32xf32>
    %11 = tpu.matmul %9, %10, %cst_8 {dimension_numbers = #tpu.dot_dimension_numbers<[1], [0], [0], [1], [0, 0, 1, 1], [], []>} : vector<8x64xbf16>, vector<64x32xbf16>, vector<8x32xf32> -> vector<8x32xf32>
    %c0_9 = arith.constant 0 : index
    %c0_10 = arith.constant 0 : index
    %12 = vector.load %arg5[%c0_9, %c0_10] : memref<1x32xf32, #tpu.memory_space<vmem>>, vector<1x32xf32>
    %13 = vector.broadcast %12 : vector<1x32xf32> to vector<8x32xf32>
    %14 = arith.addf %11, %13 : vector<8x32xf32>
    %cst_11 = arith.constant 0.000000e+00 : f32
    %15 = vector.broadcast %cst_11 : f32 to vector<8x32xf32>
    %16 = arith.maximumf %14, %15 : vector<8x32xf32>
    %cst_12 = arith.constant dense<0xFF800000> : vector<8xf32>
    %17 = vector.multi_reduction <maximumf>, %16, %cst_12 [1] : vector<8x32xf32> to vector<8xf32>
    %18 = vector.shape_cast %17 : vector<8xf32> to vector<8x1xf32>
    %19 = vector.broadcast %18 : vector<8x1xf32> to vector<8x32xf32>
    %20 = arith.subf %16, %19 : vector<8x32xf32>
    %21 = math.exp %20 : vector<8x32xf32>
    %cst_13 = arith.constant dense<0.000000e+00> : vector<8xf32>
    %22 = vector.multi_reduction <add>, %21, %cst_13 [1] : vector<8x32xf32> to vector<8xf32>
    %23 = vector.shape_cast %22 : vector<8xf32> to vector<8x1xf32>
    %24 = vector.broadcast %23 : vector<8x1xf32> to vector<8x32xf32>
    %25 = arith.divf %21, %24 : vector<8x32xf32>
    %c0_14 = arith.constant 0 : index
    %c0_15 = arith.constant 0 : index
    %26 = vector.load %arg6[%c0_14, %c0_15] : memref<8x32xf32, #tpu.memory_space<vmem>>, vector<8x32xf32>
    tpu.vector_store %arg6[%c0_14, %c0_15], %25 {strides = array<i32>} : memref<8x32xf32, #tpu.memory_space<vmem>>, vector<8x32xf32>,
    return
  }
  func.func @transform_0(%arg0: i32) -> (i32, i32) {
    %c0_i32 = arith.constant 0 : i32
    %c0_i32_0 = arith.constant 0 : i32
    return %arg0, %c0_i32 : i32, i32
  }
  func.func @transform_1(%arg0: i32) -> (i32, i32) {
    %c0_i32 = arith.constant 0 : i32
    %c0_i32_0 = arith.constant 0 : i32
    %c0_i32_1 = arith.constant 0 : i32
    return %c0_i32, %c0_i32_0 : i32, i32
  }
  func.func @transform_2(%arg0: i32) -> (i32, i32) {
    %c0_i32 = arith.constant 0 : i32
    %c0_i32_0 = arith.constant 0 : i32
    %c0_i32_1 = arith.constant 0 : i32
    return %c0_i32, %c0_i32_0 : i32, i32
  }
  func.func @transform_3(%arg0: i32) -> (i32, i32) {
    %c0_i32 = arith.constant 0 : i32
    %c0_i32_0 = arith.constant 0 : i32
    %c0_i32_1 = arith.constant 0 : i32
    return %c0_i32, %c0_i32_0 : i32, i32
  }
  func.func @transform_4(%arg0: i32) -> (i32, i32) {
    %c0_i32 = arith.constant 0 : i32
    %c0_i32_0 = arith.constant 0 : i32
    %c0_i32_1 = arith.constant 0 : i32
    return %c0_i32, %c0_i32_0 : i32, i32
  }
  func.func @transform_5(%arg0: i32) -> (i32, i32) {
    %c0_i32 = arith.constant 0 : i32
    %c0_i32_0 = arith.constant 0 : i32
    return %arg0, %c0_i32 : i32, i32
  }
}

</mosaic_0001>

<bundles_post_ra>
// kernel: tpu_custom_call.1
= control target key start
LH: loop header
LB: loop body
LE: loop exit
PB: predicated region body
PF: predicated region fallthrough
CT: control target
= control target key end

     0   :  { %v944_v44 = vmov 0.0   ;;  %vm945_vm0 = vmmov 0   ;;  %vm435_vm1 = vcmask 130048   ;;  %s1180_s0 = inlined_call_operand.vmem [shape: f32[8,784], index: 0, kind: input, shape index: {}]   ;;  %s1181_s1 = inlined_call_operand.vmem [shape: bf16[784,64], index: 1, kind: input, shape index: {}]   ;;  %s1182_s2 = inlined_call_operand.vmem [shape: f32[1,64], index: 2, kind: input, shape index: {}]   ;;  %s1183_s3 = inlined_call_operand.vmem [shape: bf16[64,32], index: 3, kind: input, shape index: {}]   ;;  %s1184_s4 = inlined_call_operand.vmem [shape: f32[1,32], index: 4, kind: input, shape index: {}]   ;;  %s1185_s5 = inlined_call_operand.hbm [shape: f32[8,32], index: 5, kind: output, shape index: {}]  }
   0x1   :  { %v863_v0 = vld [vmem:[%s1181_s1 + $0x40] sm:$0xff]   ;;  %v867_v4 = vld [vmem:[%s1181_s1 + $0x48] sm:$0xff]   ;;  %v871_v8 = vld [vmem:[%s1181_s1 + $0x50] sm:$0xff]  }
   0x2   :  { %v864_v1 = vld [vmem:[%s1181_s1] sm:$0xff]   ;;  %769 = vmatprep.subr.bf16.mxu0 %v863_v0  ;;  %v868_v5 = vld [vmem:[%s1181_s1 + $0x8] sm:$0xff]   ;;  %v872_v9 = vld [vmem:[%s1181_s1 + $0x10] sm:$0xff]  }
   0x3   :  { %v865_v2 = vld [vmem:[%s1181_s1 + $0xc0] sm:$0xff]   ;;  %770 = vmatpush3.bf16.msra.mxu0 %v864_v1  ;;  %v869_v6 = vld [vmem:[%s1181_s1 + $0xc8] sm:$0xff]   ;;  %v873_v10 = vld [vmem:[%s1181_s1 + $0xd0] sm:$0xff]  }
   0x4   :  { %v866_v3 = vld [vmem:[%s1181_s1 + $0x80] sm:$0xff]   ;;  %791 = vmatprep.subr.bf16.mxu1 %v865_v2  ;;  %771 = vmatprep.subr.bf16.mxu0 %v867_v4  ;;  %v870_v7 = vld [vmem:[%s1181_s1 + $0x88] sm:$0xff]   ;;  %v874_v11 = vld [vmem:[%s1181_s1 + $0x90] sm:$0xff]  }
   0x5   :  { %792 = vmatpush3.bf16.msra.mxu1 %v866_v3  ;;  %v875_v12 = vld [vmem:[%s1181_s1 + $0x58] sm:$0xff]   ;;  %v879_v16 = vld [vmem:[%s1181_s1 + $0x60] sm:$0xff]   ;;  %v883_v20 = vld [vmem:[%s1181_s1 + $0x68] sm:$0xff]  }
   0x6   :  { %793 = vmatprep.subr.bf16.mxu1 %v869_v6  ;;  %v876_v13 = vld [vmem:[%s1181_s1 + $0x18] sm:$0xff]   ;;  %v880_v17 = vld [vmem:[%s1181_s1 + $0x20] sm:$0xff]   ;;  %v884_v21 = vld [vmem:[%s1181_s1 + $0x28] sm:$0xff]  }
   0x7   :  { %772 = vmatpush3.bf16.msra.mxu0 %v868_v5  ;;  %v877_v14 = vld [vmem:[%s1181_s1 + $0xd8] sm:$0xff]   ;;  %v881_v18 = vld [vmem:[%s1181_s1 + $0xe0] sm:$0xff]   ;;  %v885_v22 = vld [vmem:[%s1181_s1 + $0xe8] sm:$0xff]  }
   0x8   :  { %773 = vmatprep.subr.bf16.mxu0 %v871_v8  ;;  %v878_v15 = vld [vmem:[%s1181_s1 + $0x98] sm:$0xff]   ;;  %v882_v19 = vld [vmem:[%s1181_s1 + $0xa0] sm:$0xff]   ;;  %v886_v23 = vld [vmem:[%s1181_s1 + $0xa8] sm:$0xff]  }
   0x9   :  { %794 = vmatpush3.bf16.msra.mxu1 %v870_v7  ;;  %v887_v24 = vld [vmem:[%s1181_s1 + $0x70] sm:$0xff]   ;;  %v891_v28 = vld [vmem:[%s1181_s1 + $0x78] sm:$0xff]   ;;  %v23_v31 = vld [vmem:[%s1180_s0 + $0x8] sm:$0xff] }
   0xa   :  { %795 = vmatprep.subr.bf16.mxu1 %v873_v10  ;;  %v888_v25 = vld [vmem:[%s1181_s1 + $0x30] sm:$0xff]   ;;  %v892_v29 = vld [vmem:[%s1181_s1 + $0x38] sm:$0xff]   ;;  %v30_v32 = vpack.c.bf16 %v23_v31, %v23_v31  ;;  %v22_v34 = vld [vmem:[%s1180_s0] sm:$0xff] }
   0xb   :  { %774 = vmatpush3.bf16.msra.mxu0 %v872_v9  ;;  %v889_v26 = vld [vmem:[%s1181_s1 + $0xf0] sm:$0xff]   ;;  %v893_v30 = vld [vmem:[%s1181_s1 + $0xf8] sm:$0xff]   ;;  %v29_v35 = vpack.c.bf16 %v22_v34, %v22_v34  ;;  %v895_v36 = vld [vmem:[%s1181_s1 + $0x140] sm:$0xff]  }
   0xc   :  { %775 = vmatprep.subr.bf16.mxu0 %v875_v12  ;;  %v890_v27 = vld [vmem:[%s1181_s1 + $0xb0] sm:$0xff]   ;;  %v894_v33 = vld [vmem:[%s1181_s1 + $0xb8] sm:$0xff]   ;;  %471 = vmatprep.mubr.bf16.mxu0 %v30_v32  ;;  %v896_v39 = vld [vmem:[%s1181_s1 + $0x100] sm:$0xff]  }
   0xd   :  { %796 = vmatpush3.bf16.msra.mxu1 %v874_v11  ;;  %v25_v37 = vld [vmem:[%s1180_s0 + $0x18] sm:$0xff]  ;;  %v24_v40 = vld [vmem:[%s1180_s0 + $0x10] sm:$0xff]  ;;  %v897_v42 = vld [vmem:[%s1181_s1 + $0x148] sm:$0xff]  }
   0xe   :  { %797 = vmatprep.subr.bf16.mxu1 %v877_v14  ;;  %v32_v38 = vpack.c.bf16 %v25_v37, %v25_v37  ;;  %v31_v41 = vpack.c.bf16 %v24_v40, %v24_v40  ;;  %v898_v43 = vld [vmem:[%s1181_s1 + $0x108] sm:$0xff]   ;;  %v899_v45 = vld [vmem:[%s1181_s1 + $0x150] sm:$0xff]   ;;  %v901_v47 = vld [vmem:[%s1181_s1 + $0x158] sm:$0xff]  }
   0xf   :  { %776 = vmatpush3.bf16.msra.mxu0 %v876_v13  ;;  %v900_v46 = vld [vmem:[%s1181_s1 + $0x110] sm:$0xff]   ;;  %v902_v48 = vld [vmem:[%s1181_s1 + $0x118] sm:$0xff]   ;;  %v903_v49 = vld [vmem:[%s1181_s1 + $0x160] sm:$0xff]  }
  0x10   :  { %777 = vmatprep.subr.bf16.mxu0 %v879_v16  ;;  %511 = vmatprep.mubr.bf16.mxu1 %v32_v38  ;;  %v904_v50 = vld [vmem:[%s1181_s1 + $0x120] sm:$0xff]   ;;  %v905_v51 = vld [vmem:[%s1181_s1 + $0x168] sm:$0xff]   ;;  %v907_v55 = vld [vmem:[%s1181_s1 + $0x170] sm:$0xff]  }
  0x11   :  { %798 = vmatpush3.bf16.msra.mxu1 %v878_v15  ;;  %v906_v52 = vld [vmem:[%s1181_s1 + $0x128] sm:$0xff]   ;;  %v911_v53 = vld [vmem:[%s1181_s1 + $0x180] sm:$0xff]   ;;  %v28_v57 = vld [vmem:[%s1180_s0 + $0x30] sm:$0xff] }
  0x12   :  { %799 = vmatprep.subr.bf16.mxu1 %v881_v18  ;;  %v27_v54 = vld [vmem:[%s1180_s0 + $0x28] sm:$0xff]  ;;  %v35_v58 = vpack.c.bf16 %v28_v57, %v28_v57 }
  0x13   :  { %778 = vmatpush3.bf16.msra.mxu0 %v880_v17  ;;  %v34_v56 = vpack.c.bf16 %v27_v54, %v27_v54 }
  0x14   :  { %779 = vmatprep.subr.bf16.mxu0 %v883_v20 }
  0x15   :  { %800 = vmatpush3.bf16.msra.mxu1 %v882_v19 }
  0x16   :  { %801 = vmatprep.subr.bf16.mxu1 %v885_v22 }
  0x17   :  { %780 = vmatpush3.bf16.msra.mxu0 %v884_v21 }
  0x18   :  { %781 = vmatprep.subr.bf16.mxu0 %v887_v24 }
  0x19   :  { %802 = vmatpush3.bf16.msra.mxu1 %v886_v23 }
  0x1a   :  { %803 = vmatprep.subr.bf16.mxu1 %v889_v26 }
  0x1b   :  { %782 = vmatpush3.bf16.msra.mxu0 %v888_v25 }
  0x1c   :  { %783 = vmatprep.subr.bf16.mxu0 %v891_v28 }
  0x1d   :  { %804 = vmatpush3.bf16.msra.mxu1 %v890_v27 }
  0x1e   :  { %805 = vmatprep.subr.bf16.mxu1 %v893_v30 }
  0x1f   :  { %784 = vmatpush3.bf16.msra.mxu0 %v892_v29 }
  0x20   :  { %813 = vmatprep.subr.bf16.mxu0 %v895_v36 }
  0x21   :  { %806 = vmatpush3.bf16.msra.mxu1 %v894_v33 }
  0x22   :  { %472 = vmatmul.mubr.bf16.vlgmr.msra.gmra.mrb[0].mxu0 %v29_v35  ;;  %842 = vmatprep.subr.bf16.mxu1 %v944_v44 }
  0x23   :  { %814 = vmatpush3.bf16.msra.mxu0 %v896_v39  ;;  %551 = vmatprep.mubr.bf16.mxu0 %v34_v56 }
  0x24   :  { %512 = vmatmul.mubr.bf16.vlgmr.msra.gmra.mrb[0].mxu1 %v31_v41  ;;  %815 = vmatprep.subr.bf16.mxu0 %v897_v42 }
  0x25   :  { %844 = vmatprep.mubr.msk.bf16.mxu1 %vm945_vm0, %v944_v44  ;;  %843 = vmatpush3.bf16.msra.mxu1 %v911_v53 }
  0x26   :  { %848 = vmatprep.subr.bf16.mxu1 %v944_v44 }
  0x27   :  { %816 = vmatpush3.bf16.msra.mxu0 %v898_v43 }
  0x28   :  { %817 = vmatprep.subr.bf16.mxu0 %v899_v45 }
  0x2b   :  { %818 = vmatpush3.bf16.msra.mxu0 %v900_v46 }
  0x2c   :  { %819 = vmatprep.subr.bf16.mxu0 %v901_v47 }
  0x2f   :  { %820 = vmatpush3.bf16.msra.mxu0 %v902_v48 }
  0x30   :  { %821 = vmatprep.subr.bf16.mxu0 %v903_v49 }
  0x33   :  { %822 = vmatpush3.bf16.msra.mxu0 %v904_v50 }
  0x34   :  { %823 = vmatprep.subr.bf16.mxu0 %v905_v51 }
  0x35   :  { %10 = vsyncpa [#allocation3], 0  ;;  %845 = vmatmul.mubr.msk.bf16.vlgmr.msra.gmra.mrb[4].mxu1 %vm435_vm1, %v35_v58  ;;  %v908_v59 = vld [vmem:[%s1181_s1 + $0x130] sm:$0xff]   ;;  %v909_v60 = vld [vmem:[%s1181_s1 + $0x178] sm:$0xff]   ;;  %vm640_vm2 = vcmask 523264   ;;  %vm685_vm3 = vcmask 261120  }
  0x36   :  { %856 = vmatprep.mubr.msk.bf16.mxu1 %vm945_vm0, %v944_v44  ;;  %v910_v61 = vld [vmem:[%s1181_s1 + $0x138] sm:$0xff]   ;;  %v26_v62 = vld [vmem:[%s1180_s0 + $0x20] sm:$0xff]  ;;  %v913_v1 = vld [vmem:[%s1183_s3 + $0x8] sm:$0xff]  }
  0x37   :  { %824 = vmatpush3.bf16.msra.mxu0 %v906_v52  ;;  %v33_v63 = vpack.c.bf16 %v26_v62, %v26_v62  ;;  %v912_v0 = vld [vmem:[%s1183_s3] sm:$0xff]   ;;  %v914_v2 = vld [vmem:[%s1183_s3 + $0x10] sm:$0xff]   ;;  %v915_v3 = vld [vmem:[%s1183_s3 + $0x18] sm:$0xff]  }
  0x38   :  { %825 = vmatprep.subr.bf16.mxu0 %v907_v55  ;;  %849 = vmatpush3.bf16.msra.mxu1 %v912_v0  ;;  %v712_v5 = vld [vmem:[%s1182_s2] ss:$0 sm:$0xff] }
  0x39   :  { %850 = vmatprep.subr.bf16.mxu1 %v944_v44  ;;  %v763_v30 = vld [vmem:[%s1184_s4] ss:$0 sm:$0xff]  ;;  %s946_s4 = smov [#allocation2]  }
  0x3a   :  { %s704_s13 = sshll.u32 %s946_s4, 4  ;;  %s705_s13 = int_to_ptr.vmem [resolvable:$true] %s704_s13 }
  0x3b   :  { %826 = vmatpush3.bf16.msra.mxu0 %v908_v59  ;;  %s920_s14 = scalar_lea.vmem %s705_s13, 128  ;;  %p925_p1 = scmp.lt.s32.totalorder %s705_s13, %s705_s13 }
  0x3c   :  { %827 = vmatprep.subr.bf16.mxu0 %v909_v60  ;;  %851 = vmatpush3.bf16.msra.mxu1 %v913_v1  ;;  %p921_p0 = scmp.ne.s32.totalorder %s705_s13, %s920_s14  ;;  %p926_p2 = scmp.lt.s32.totalorder %s920_s14, %s920_s14 }
  0x3d   :  { %852 = vmatprep.subr.bf16.mxu1 %v944_v44 }
  0x3e   :  { %p927_p3 = por %p926_p2, %p925_p1 }
  0x3f   :  { %828 = vmatpush3.bf16.msra.mxu0 %v910_v61 }
  0x40   :  { %853 = vmatpush3.bf16.msra.mxu1 %v914_v2  ;;  %p928_p4 = pnand %p927_p3, %p921_p0 }
  0x41   :  { %854 = vmatprep.subr.bf16.mxu1 %v944_v44 }
  0x42   :  { %552 = vmatmul.mubr.bf16.vlgmr.msra.gmra.mrb[4].mxu0 %v33_v63 }
  0x44   :  { %855 = vmatpush3.bf16.msra.mxu1 %v915_v3 }
  0xf5   :  { %v785_v4 = vpop.f32.mrb[0].mxu0 }
  0xf6   :  { %v786_v6 = vpop.f32.mrb[1].mxu0 }
  0xf7   :  { %v787_v7 = vadd.f32 %v786_v6, %v785_v4  ;;  %v788_v8 = vpop.f32.mrb[2].mxu0  ;;  %v807_v9 = vpop.f32.mrb[0].mxu1 }
  0xf8   :  { %v789_v10 = vpop.f32.mrb[3].mxu0  ;;  %v808_v12 = vpop.f32.mrb[1].mxu1 }
  0xf9   :  { %v474_v11 = vadd.f32 %v787_v7, %v712_v5  ;;  %v809_v13 = vadd.f32 %v808_v12, %v807_v9  ;;  %v810_v14 = vpop.f32.mrb[2].mxu1 }
  0xfa   :  { %v811_v15 = vpop.f32.mrb[3].mxu1 }
  0xfb   :  { %v514_v16 = vadd.f32 %v809_v13, %v474_v11 }
 0x108   :  { %v593_v17 = vpop.f32.mrb[4].mxu1 }
 0x109   :  { %v846_v18 = vpop.f32.mrb[5].mxu1 }
 0x10a   :  { %v596_v19 = vpop.f32.mrb[6].mxu1 }
 0x10b   :  { %v847_v20 = vpop.f32.mrb[7].mxu1 }
 0x115   :  { %v829_v21 = vpop.f32.mrb[4].mxu0 }
 0x116   :  { %v830_v22 = vpop.f32.mrb[5].mxu0 }
 0x117   :  { %v831_v23 = vadd.f32 %v830_v22, %v829_v21  ;;  %v832_v24 = vpop.f32.mrb[6].mxu0 }
 0x118   :  { %v833_v25 = vpop.f32.mrb[7].mxu0 }
 0x119   :  { %v554_v26 = vadd.f32 %v831_v23, %v514_v16 }
 0x11b   :  { %v594_v27 = vadd.f32 %v593_v17, %v554_v26 }
 0x11d   :  { %v599_v28 = vmax.f32 %v594_v27, 0.0 }
 0x11f   :  { %v600_v29 = vpack.c.bf16 %v599_v28, %v599_v28 }
 0x121   :  { %857 = vmatmul.mubr.msk.bf16.vlgmr.msra.gmra.mrb[8].mxu1 %vm640_vm2, %v600_v29 }
 0x1f4   :  { %v678_v31 = vpop.f32.mrb[8].mxu1 }
 0x1f5   :  { %v679_v32 = vadd.f32 %v763_v30, %v678_v31  ;;  %v858_v33 = vpop.f32.mrb[9].mxu1 }
 0x1f6   :  { %v681_v34 = vpop.f32.mrb[10].mxu1 }
 0x1f7   :  { %v684_v35 = vmax.f32 %v679_v32, 0.0  ;;  %v859_v36 = vpop.f32.mrb[11].mxu1 }
 0x1f9   :  { %v686_v37 = vsel %vm685_vm3, %v684_v35, -inf }
 0x1fa   :  { %687 = vmax.xlane.f32.xlu0 %v686_v37 }
 0x287   :  { %v688_v38 = vpop.xlane.xlu0 %687 }
 0x288   :  { %v689_v39 = vsub.f32 %v684_v35, %v688_v38 }
 0x28a   :  { %v690_v40 = vmul.f32 1.442695, %v689_v39 }
 0x28c   :  { %916 = vpow2.f32 %v690_v40 }
 0x296   :  { %v917_v41 = vpop.eup %916 }
 0x297   :  { %v692_v42 = vsel %vm685_vm3, %v917_v41, 0.0 }
 0x298   :  { %693 = vadd.xlane.f32.xlu0 %v692_v42 }
 0x325   :  { %v694_v43 = vpop.xlane.xlu0 %693 }
 0x326   :  { %918 = vrcp.f32 %v694_v43 }
 0x330   :  { %v919_v44 = vpop.eup %918 }
 0x331   :  { %v696_v45 = vmul.f32 %v919_v44, %v917_v41 }
 0x333   :  { %697 = vst.msk [vmem:[#allocation2] sm:$0xff] %vm685_vm3, %v696_v45 }
 0x334   :  { %931 = shalt.err (!%p928_p4)
}
 0x335   :  { %s932_s17 = scalar_lea.hbm %s1185_s5, 128 }
 0x336   :  { %p933_p5 = scmp.ne.s32.totalorder %s1185_s5, %s932_s17  ;;  %p936_p6 = scmp.lt.u32.totalorder %s932_s17, %s1185_s5 }
 0x338   :  { %p938_p7 = pnand %p936_p6, %p933_p5 }
 0x33a   :  { %941 = shalt.err (!%p938_p7)
}
 0x33b   :  { %707 = dma.vmem_to_hbm [thread:$0]  %s705_s13, 128, %s1185_s5, [#allocation3]  }
 0x33c   :  { %942 = dma.done.wait [#allocation3], 128  }
 0x33d   :  { %943 = vsyncadd [#allocation3], 4294967168 }
 0x33e   :  { %711 = vsyncpa [#allocation3], 1 }

</bundles_post_ra>
